<compile_context>
chip_gen: v6e
topology: v6e:2x2x1
jax: 0.10.0
libtpu: 0.0.40
codegen_flags: <defaults>
</compile_context>

<pallas_src>
import functools

import jax
import jax.numpy as jnp
from jax import lax
from jax.experimental import pallas as pl
from jax.experimental.pallas import tpu as pltpu

HIDDEN = 256
LANE = 128


def _round_up(x, m):
    return ((x + m - 1) // m) * m


def _has_two_tensorcores():
    """True on chips with 2 TensorCores (v7x); safe fallback is False."""
    try:
        kind = jax.devices()[0].device_kind.lower()
    except Exception:
        return False
    return "v7" in kind


def _reward_mlp_kernel(x_ref, w1_ref, b1_ref, w2_ref, b2_ref, w3_ref, b3_ref,
                       out_ref, *, output_dim):
    # Matmuls run at the weights' dtype (f32 or bf16) with f32 accumulation;
    # the bias-add / ReLU / clamp epilogue stays f32 (safe on v5e: no bf16 VPU).
    cdt = w1_ref.dtype

    # Layer 1: x @ W1 + b1, ReLU
    h1 = jnp.dot(x_ref[...], w1_ref[...], preferred_element_type=jnp.float32)
    h1 = jnp.maximum(h1 + b1_ref[...], 0.0)

    # Layer 2: h1 @ W2 + b2, ReLU
    h2 = jnp.dot(h1.astype(cdt), w2_ref[...],
                 preferred_element_type=jnp.float32)
    h2 = jnp.maximum(h2 + b2_ref[...], 0.0)

    # Layer 3: h2 @ W3 + b3 (lane-dense, padded to a 128 multiple).
    out = jnp.dot(h2.astype(cdt), w3_ref[...],
                  preferred_element_type=jnp.float32)
    out = out + b3_ref[...]

    # In-kernel clamp of the log_var lanes [output_dim, 2*output_dim).
    # Mean lanes are untouched; padded lanes are exact zeros either way.
    lane = lax.broadcasted_iota(jnp.int32, out.shape, 1)
    is_log_var = jnp.logical_and(lane >= output_dim, lane < 2 * output_dim)
    out = jnp.where(is_log_var, jnp.clip(out, -1.0, 2.0), out)

    out_ref[...] = out.astype(out_ref.dtype)


def reward_network_forward(x, params, *, output_dim, block_m=512,
                           compute_dtype=jnp.bfloat16):
    """Reward_network forward pass as one fused Pallas kernel.

    x: [B, input_dim] float32
    params: dict with w1 [in,256], b1 [1,256], w2 [256,256], b2 [1,256],
            w3 [256, 2*output_dim], b3 [1, 2*output_dim]
    compute_dtype: dtype fed to the MXU (bf16 recommended; f32 for tight tol).
    returns: (mean [B, output_dim], log_var [B, output_dim]) in float32,
             with log_var clamped to [-1, 2].
    """
    B, input_dim = x.shape
    n_out = 2 * output_dim
    n_pad = _round_up(n_out, LANE)  # lane-dense layer-3 / output width

    compute_dtype = jnp.dtype(compute_dtype)
    # Native sublane tile: 8 rows for 4-byte dtypes, 16 for 2-byte.
    min_rows = max(8, 32 // compute_dtype.itemsize)

    # --- batch tile selection -------------------------------------------
    # Target ~block_m-row tiles (capped at 1024 for v5e VMEM headroom), but
    # pick block_m = round_up(cdiv(B, n_steps), min_rows) so tail padding is
    # < min_rows rows. On 2-TC chips, split single-step grids into 2 steps so
    # the "parallel" axis can shard across both TensorCores.
    target = min(max(block_m, min_rows), 1024)
    n_steps = pl.cdiv(B, target)
    if _has_two_tensorcores() and n_steps == 1 and B >= 2 * min_rows:
        n_steps = 2
    bm = _round_up(pl.cdiv(B, n_steps), min_rows)
    B_pad = _round_up(B, bm)
    if B_pad != B:
        x = jnp.pad(x, ((0, B_pad - B), (0, 0)))

    # Zero-pad layer-3 columns to the lane-dense width (padded columns compute
    # exact zeros and are sliced off below).
    w3 = params["w3"]
    b3 = params["b3"]
    if w3.shape[1] != n_pad:
        w3 = jnp.pad(w3, ((0, 0), (0, n_pad - w3.shape[1])))
        b3 = jnp.pad(b3, ((0, 0), (0, n_pad - b3.shape[1])))

    # MXU operands (weights + activations) in compute_dtype; biases stay f32.
    x_c = x.astype(compute_dtype)
    w1 = params["w1"].astype(compute_dtype)
    w2 = params["w2"].astype(compute_dtype)
    w3 = w3.astype(compute_dtype)
    b1 = params["b1"].astype(jnp.float32)
    b2 = params["b2"].astype(jnp.float32)
    b3 = b3.astype(jnp.float32)

    # Output in compute_dtype: halves padded-output HBM write traffic in bf16;
    # f32 path keeps exact f32 output for tight tolerances.
    out_dtype = compute_dtype

    grid = (B_pad // bm,)

    # Constant index maps => weights/biases are DMA'd once and held resident
    # in VMEM across the whole batch grid.
    resident = lambda shape: pl.BlockSpec(shape, lambda i: (0, 0))

    flops = 2 * B_pad * (input_dim * HIDDEN + HIDDEN * HIDDEN + HIDDEN * n_pad)
    bytes_accessed = (
        x_c.size * x_c.dtype.itemsize
        + sum(a.size * a.dtype.itemsize for a in (w1, b1, w2, b2, w3, b3))
        + B_pad * n_pad * jnp.dtype(out_dtype).itemsize)

    out = pl.pallas_call(
        functools.partial(_reward_mlp_kernel, output_dim=output_dim),
        out_shape=jax.ShapeDtypeStruct((B_pad, n_pad), out_dtype),
        grid_spec=pltpu.PrefetchScalarGridSpec(
            num_scalar_prefetch=0,
            grid=grid,
            in_specs=[
                pl.BlockSpec((bm, input_dim), lambda i: (i, 0)),  # x tile
                resident(w1.shape),
                resident(b1.shape),
                resident(w2.shape),
                resident(b2.shape),
                resident(w3.shape),
                resident(b3.shape),
            ],
            out_specs=pl.BlockSpec((bm, n_pad), lambda i: (i, 0)),
        ),
        compiler_params=pltpu.CompilerParams(
            dimension_semantics=("parallel",),
            vmem_limit_bytes=32 * 1024 * 1024),
        cost_estimate=pl.CostEstimate(
            flops=flops, transcendentals=0, bytes_accessed=bytes_accessed),
    )(x_c, w1, b1, w2, b2, w3, b3)

    out = out[:B].astype(jnp.float32)
    mean = out[:, :output_dim]
    log_var = out[:, output_dim:n_out]   # already clamped in-kernel
    return mean, log_var


def init_params(key, input_dim, output_dim):
    """Deterministic init matching nn.Linear's uniform(-1/sqrt(fan_in), ...)."""
    def linear(k, fan_in, fan_out):
        kw, kb = jax.random.split(k)
        bound = 1.0 / jnp.sqrt(fan_in)
        # Stored as [in, out] (transpose of PyTorch's [out, in]).
        w = jax.random.uniform(kw, (fan_in, fan_out), jnp.float32, -bound, bound)
        b = jax.random.uniform(kb, (1, fan_out), jnp.float32, -bound, bound)
        return w, b

    k1, k2, k3 = jax.random.split(key, 3)
    w1, b1 = linear(k1, input_dim, HIDDEN)
    w2, b2 = linear(k2, HIDDEN, HIDDEN)
    w3, b3 = linear(k3, HIDDEN, output_dim * 2)
    return {"w1": w1, "b1": b1, "w2": w2, "b2": b2, "w3": w3, "b3": b3}


def reference_forward(x, params, output_dim):
    h1 = jax.nn.relu(x @ params["w1"] + params["b1"])
    h2 = jax.nn.relu(h1 @ params["w2"] + params["b2"])
    out = h2 @ params["w3"] + params["b3"]
    mean, log_var = out[:, :output_dim], out[:, output_dim:]
    return mean, jnp.clip(log_var, -1.0, 2.0)


if __name__ == "__main__":
    key = jax.random.PRNGKey(0)
    k_param, k_x = jax.random.split(key)

    batch = 2
    input_dim = 32     # e.g. state_dim + action_dim
    output_dim = 8

    params = init_params(k_param, input_dim, output_dim)
    x = jax.random.normal(k_x, (batch, input_dim), jnp.float32)
    ref_mean, ref_log_var = reference_forward(x, params, output_dim)

    # f32 MXU path (tight tolerance).
    fwd_f32 = jax.jit(functools.partial(
        reward_network_forward, output_dim=output_dim,
        compute_dtype=jnp.float32))
    mean, log_var = fwd_f32(x, params)
    jax.block_until_ready((mean, log_var))

    assert mean.shape == (batch, output_dim)
    assert log_var.shape == (batch, output_dim)
    assert jnp.allclose(mean, ref_mean, atol=1e-4, rtol=1e-4)
    assert jnp.allclose(log_var, ref_log_var, atol=1e-4, rtol=1e-4)
    assert float(log_var.min()) >= -1.0 and float(log_var.max()) <= 2.0

    # bf16 MXU path (default) — looser tolerance.
    fwd_bf16 = jax.jit(functools.partial(
        reward_network_forward, output_dim=output_dim,
        compute_dtype=jnp.bfloat16))
    mean_b, log_var_b = fwd_bf16(x, params)
    jax.block_until_ready((mean_b, log_var_b))
    assert jnp.allclose(mean_b, ref_mean, atol=5e-2, rtol=5e-2)
    assert jnp.allclose(log_var_b, ref_log_var, atol=5e-2, rtol=5e-2)
    assert float(log_var_b.min()) >= -1.0 and float(log_var_b.max()) <= 2.0

    # Medium batch (tail-padding-minimizing tile; 1 step on 1-TC, 2 on v7x).
    xb = jax.random.normal(jax.random.PRNGKey(1), (300, input_dim), jnp.float32)
    mb, lb = fwd_f32(xb, params)
    jax.block_until_ready((mb, lb))
    rmb, rlb = reference_forward(xb, params, output_dim)
    assert jnp.allclose(mb, rmb, atol=1e-4, rtol=1e-4)
    assert jnp.allclose(lb, rlb, atol=1e-4, rtol=1e-4)

    # Larger batch exercising a multi-step grid (>1 tile on every chip).
    xc = jax.random.normal(jax.random.PRNGKey(2), (1100, input_dim), jnp.float32)
    mc, lc = fwd_f32(xc, params)
    jax.block_until_ready((mc, lc))
    rmc, rlc = reference_forward(xc, params, output_dim)
    assert jnp.allclose(mc, rmc, atol=1e-4, rtol=1e-4)
    assert jnp.allclose(lc, rlc, atol=1e-4, rtol=1e-4)

    print("KERNEL_OK")
</pallas_src>

<mosaic_0001>
module attributes {stable_mosaic.version = 11 : i64} {
  func.func @_reward_mlp_kernel(%arg0: i32, %arg1: memref<8x32xf32, #tpu.memory_space<vmem>>, %arg2: memref<32x256xf32, #tpu.memory_space<vmem>>, %arg3: memref<1x256xf32, #tpu.memory_space<vmem>>, %arg4: memref<256x256xf32, #tpu.memory_space<vmem>>, %arg5: memref<1x256xf32, #tpu.memory_space<vmem>>, %arg6: memref<256x128xf32, #tpu.memory_space<vmem>>, %arg7: memref<1x128xf32, #tpu.memory_space<vmem>>, %arg8: memref<8x128xf32, #tpu.memory_space<vmem>>) attributes {dimension_semantics = [#tpu.dimension_semantics<parallel>], iteration_bounds = array<i64: 1>, scalar_prefetch = 0 : i64, scratch_operands = 0 : i64, tpu.core_type = #tpu.core_type<tc>, window_params = [{transform_indices = @transform_0, window_bounds = array<i64: 8, 32>}, {pipeline_mode = #tpu.pipeline_mode<synchronous>, transform_indices = @transform_1, window_bounds = array<i64: 32, 256>}, {pipeline_mode = #tpu.pipeline_mode<synchronous>, transform_indices = @transform_2, window_bounds = array<i64: 1, 256>}, {pipeline_mode = #tpu.pipeline_mode<synchronous>, transform_indices = @transform_3, window_bounds = array<i64: 256, 256>}, {pipeline_mode = #tpu.pipeline_mode<synchronous>, transform_indices = @transform_4, window_bounds = array<i64: 1, 256>}, {pipeline_mode = #tpu.pipeline_mode<synchronous>, transform_indices = @transform_5, window_bounds = array<i64: 256, 128>}, {pipeline_mode = #tpu.pipeline_mode<synchronous>, transform_indices = @transform_6, window_bounds = array<i64: 1, 128>}, {transform_indices = @transform_7, window_bounds = array<i64: 8, 128>}]} {
    %c0 = arith.constant 0 : index
    %c0_0 = arith.constant 0 : index
    %0 = vector.load %arg1[%c0, %c0_0] : memref<8x32xf32, #tpu.memory_space<vmem>>, vector<8x32xf32>
    %c0_1 = arith.constant 0 : index
    %c0_2 = arith.constant 0 : index
    %1 = vector.load %arg2[%c0_1, %c0_2] : memref<32x256xf32, #tpu.memory_space<vmem>>, vector<32x256xf32>
    %cst = arith.constant dense<0.000000e+00> : vector<8x256xf32>
    %2 = tpu.matmul %0, %1, %cst {dimension_numbers = #tpu.dot_dimension_numbers<[1], [0], [0], [1], [0, 0, 1, 1], [], []>} : vector<8x32xf32>, vector<32x256xf32>, vector<8x256xf32> -> vector<8x256xf32>
    %c0_3 = arith.constant 0 : index
    %c0_4 = arith.constant 0 : index
    %3 = vector.load %arg3[%c0_3, %c0_4] : memref<1x256xf32, #tpu.memory_space<vmem>>, vector<1x256xf32>
    %4 = vector.broadcast %3 : vector<1x256xf32> to vector<8x256xf32>
    %5 = arith.addf %2, %4 : vector<8x256xf32>
    %cst_5 = arith.constant 0.000000e+00 : f32
    %6 = vector.broadcast %cst_5 : f32 to vector<8x256xf32>
    %7 = arith.maximumf %5, %6 : vector<8x256xf32>
    %c0_6 = arith.constant 0 : index
    %c0_7 = arith.constant 0 : index
    %8 = vector.load %arg4[%c0_6, %c0_7] : memref<256x256xf32, #tpu.memory_space<vmem>>, vector<256x256xf32>
    %cst_8 = arith.constant dense<0.000000e+00> : vector<8x256xf32>
    %9 = tpu.matmul %7, %8, %cst_8 {dimension_numbers = #tpu.dot_dimension_numbers<[1], [0], [0], [1], [0, 0, 1, 1], [], []>} : vector<8x256xf32>, vector<256x256xf32>, vector<8x256xf32> -> vector<8x256xf32>
    %c0_9 = arith.constant 0 : index
    %c0_10 = arith.constant 0 : index
    %10 = vector.load %arg5[%c0_9, %c0_10] : memref<1x256xf32, #tpu.memory_space<vmem>>, vector<1x256xf32>
    %11 = vector.broadcast %10 : vector<1x256xf32> to vector<8x256xf32>
    %12 = arith.addf %9, %11 : vector<8x256xf32>
    %cst_11 = arith.constant 0.000000e+00 : f32
    %13 = vector.broadcast %cst_11 : f32 to vector<8x256xf32>
    %14 = arith.maximumf %12, %13 : vector<8x256xf32>
    %c0_12 = arith.constant 0 : index
    %c0_13 = arith.constant 0 : index
    %15 = vector.load %arg6[%c0_12, %c0_13] : memref<256x128xf32, #tpu.memory_space<vmem>>, vector<256x128xf32>
    %cst_14 = arith.constant dense<0.000000e+00> : vector<8x128xf32>
    %16 = tpu.matmul %14, %15, %cst_14 {dimension_numbers = #tpu.dot_dimension_numbers<[1], [0], [0], [1], [0, 0, 1, 1], [], []>} : vector<8x256xf32>, vector<256x128xf32>, vector<8x128xf32> -> vector<8x128xf32>
    %c0_15 = arith.constant 0 : index
    %c0_16 = arith.constant 0 : index
    %17 = vector.load %arg7[%c0_15, %c0_16] : memref<1x128xf32, #tpu.memory_space<vmem>>, vector<1x128xf32>
    %18 = vector.broadcast %17 : vector<1x128xf32> to vector<8x128xf32>
    %19 = arith.addf %16, %18 : vector<8x128xf32>
    %20 = tpu.iota {dimensions = array<i32: 1>} : vector<8x128xi32>
    %c8_i32 = arith.constant 8 : i32
    %21 = vector.broadcast %c8_i32 : i32 to vector<8x128xi32>
    %22 = arith.cmpi sge, %20, %21 : vector<8x128xi32>
    %c16_i32 = arith.constant 16 : i32
    %23 = vector.broadcast %c16_i32 : i32 to vector<8x128xi32>
    %24 = arith.cmpi slt, %20, %23 : vector<8x128xi32>
    %25 = arith.andi %22, %24 : vector<8x128xi1>
    %cst_17 = arith.constant -1.000000e+00 : f32
    %cst_18 = arith.constant 2.000000e+00 : f32
    %26 = vector.broadcast %cst_17 : f32 to vector<8x128xf32>
    %27 = arith.maximumf %26, %19 : vector<8x128xf32>
    %28 = vector.broadcast %cst_18 : f32 to vector<8x128xf32>
    %29 = arith.minimumf %28, %27 : vector<8x128xf32>
    %30 = arith.select %25, %29, %19 : vector<8x128xi1>, vector<8x128xf32>
    %c0_19 = arith.constant 0 : index
    %c0_20 = arith.constant 0 : index
    %31 = vector.load %arg8[%c0_19, %c0_20] : memref<8x128xf32, #tpu.memory_space<vmem>>, vector<8x128xf32>
    tpu.vector_store %arg8[%c0_19, %c0_20], %30 {strides = array<i32>} : memref<8x128xf32, #tpu.memory_space<vmem>>, vector<8x128xf32>,
    return
  }
  func.func @transform_0(%arg0: i32) -> (i32, i32) {
    %c0_i32 = arith.constant 0 : i32
    %c0_i32_0 = arith.constant 0 : i32
    return %arg0, %c0_i32 : i32, i32
  }
  func.func @transform_1(%arg0: i32) -> (i32, i32) {
    %c0_i32 = arith.constant 0 : i32
    %c0_i32_0 = arith.constant 0 : i32
    %c0_i32_1 = arith.constant 0 : i32
    return %c0_i32, %c0_i32_0 : i32, i32
  }
  func.func @transform_2(%arg0: i32) -> (i32, i32) {
    %c0_i32 = arith.constant 0 : i32
    %c0_i32_0 = arith.constant 0 : i32
    %c0_i32_1 = arith.constant 0 : i32
    return %c0_i32, %c0_i32_0 : i32, i32
  }
  func.func @transform_3(%arg0: i32) -> (i32, i32) {
    %c0_i32 = arith.constant 0 : i32
    %c0_i32_0 = arith.constant 0 : i32
    %c0_i32_1 = arith.constant 0 : i32
    return %c0_i32, %c0_i32_0 : i32, i32
  }
  func.func @transform_4(%arg0: i32) -> (i32, i32) {
    %c0_i32 = arith.constant 0 : i32
    %c0_i32_0 = arith.constant 0 : i32
    %c0_i32_1 = arith.constant 0 : i32
    return %c0_i32, %c0_i32_0 : i32, i32
  }
  func.func @transform_5(%arg0: i32) -> (i32, i32) {
    %c0_i32 = arith.constant 0 : i32
    %c0_i32_0 = arith.constant 0 : i32
    %c0_i32_1 = arith.constant 0 : i32
    return %c0_i32, %c0_i32_0 : i32, i32
  }
  func.func @transform_6(%arg0: i32) -> (i32, i32) {
    %c0_i32 = arith.constant 0 : i32
    %c0_i32_0 = arith.constant 0 : i32
    %c0_i32_1 = arith.constant 0 : i32
    return %c0_i32, %c0_i32_0 : i32, i32
  }
  func.func @transform_7(%arg0: i32) -> (i32, i32) {
    %c0_i32 = arith.constant 0 : i32
    %c0_i32_0 = arith.constant 0 : i32
    return %arg0, %c0_i32 : i32, i32
  }
}

</mosaic_0001>

<bundles_post_ra>
// kernel: reward_network_forward.1
= control target key start
LH: loop header
LB: loop body
LE: loop exit
PB: predicated region body
PF: predicated region fallthrough
CT: control target
= control target key end

     0   :  { %v433_v3 = vmov 0.0   ;;  %vm47_vm0 = vcmask 261120   ;;  %s801_s1 = inlined_call_operand.vmem [shape: f32[32,256], index: 1, kind: input, shape index: {}]   ;;  %s802_s3 = inlined_call_operand.vmem [shape: f32[256,256], index: 3, kind: input, shape index: {}]   ;;  %s803_s0 = inlined_call_operand.vmem [shape: f32[8,32], index: 0, kind: input, shape index: {}]   ;;  %s804_s5 = inlined_call_operand.vmem [shape: f32[256,128], index: 5, kind: input, shape index: {}]   ;;  %s805_s2 = inlined_call_operand.vmem [shape: f32[1,256], index: 2, kind: input, shape index: {}]   ;;  %s806_s4 = inlined_call_operand.vmem [shape: f32[1,256], index: 4, kind: input, shape index: {}]   ;;  %s807_s6 = inlined_call_operand.vmem [shape: f32[1,128], index: 6, kind: input, shape index: {}]   ;;  %s808_s7 = inlined_call_operand.vmem [shape: f32[8,128], index: 7, kind: output, shape index: {}]  }
   0x1   :  { %v34_v0 = vld [vmem:[%s801_s1 + $0x38] sm:$0xff]  ;;  %v33_v1 = vld [vmem:[%s801_s1 + $0x30] sm:$0xff]  ;;  %v32_v2 = vld [vmem:[%s801_s1 + $0x28] sm:$0xff]  ;;  %115 = vmatprep.mubr.f32.mxu0 %v433_v3 }
   0x2   :  { %75 = vmatprep.subr.mxu0 %v34_v0  ;;  %v31_v4 = vld [vmem:[%s801_s1 + $0x20] sm:$0xff]  ;;  %v30_v5 = vld [vmem:[%s801_s1 + $0x18] sm:$0xff]  ;;  %v29_v6 = vld [vmem:[%s801_s1 + $0x10] sm:$0xff] }
   0x3   :  { %76 = vmatpush1.msra.mxu0 %v33_v1  ;;  %v155_v7 = vld [vmem:[%s802_s3 + $0xf8] sm:$0xff]  ;;  %v154_v8 = vld [vmem:[%s802_s3 + $0xf0] sm:$0xff]  ;;  %v153_v9 = vld [vmem:[%s802_s3 + $0xe8] sm:$0xff] }
   0x4   :  { %77 = vmatprep.subr.mxu0 %v32_v2  ;;  %v28_v10 = vld [vmem:[%s801_s1 + $0x8] sm:$0xff]  ;;  %200 = vmatprep.subr.mxu1 %v155_v7  ;;  %v152_v11 = vld [vmem:[%s802_s3 + $0xe0] sm:$0xff]  ;;  %v151_v13 = vld [vmem:[%s802_s3 + $0xd8] sm:$0xff] }
   0x5   :  { %78 = vmatpush1.msra.mxu0 %v31_v4  ;;  %v27_v12 = vld [vmem:[%s801_s1] sm:$0xff]  ;;  %201 = vmatpush1.msra.mxu1 %v154_v8  ;;  %v150_v15 = vld [vmem:[%s802_s3 + $0xd0] sm:$0xff]  ;;  %v149_v16 = vld [vmem:[%s802_s3 + $0xc8] sm:$0xff] }
   0x6   :  { %79 = vmatprep.subr.mxu0 %v30_v5  ;;  %v26_v14 = vld [vmem:[%s803_s0] sm:$0xff]  ;;  %202 = vmatprep.subr.mxu1 %v153_v9  ;;  %v147_v18 = vld [vmem:[%s802_s3 + $0xb8] sm:$0xff]  ;;  %v146_v19 = vld [vmem:[%s802_s3 + $0xb0] sm:$0xff] }
   0x7   :  { %80 = vmatpush1.msra.mxu0 %v29_v6  ;;  %203 = vmatpush1.msra.mxu1 %v152_v11  ;;  %v148_v17 = vld [vmem:[%s802_s3 + $0xc0] sm:$0xff]  ;;  %v145_v20 = vld [vmem:[%s802_s3 + $0xa8] sm:$0xff]  ;;  %v143_v22 = vld [vmem:[%s802_s3 + $0x98] sm:$0xff] }
   0x8   :  { %81 = vmatprep.subr.mxu0 %v28_v10  ;;  %204 = vmatprep.subr.mxu1 %v151_v13  ;;  %v144_v21 = vld [vmem:[%s802_s3 + $0xa0] sm:$0xff]  ;;  %v142_v23 = vld [vmem:[%s802_s3 + $0x90] sm:$0xff]  ;;  %v141_v24 = vld [vmem:[%s802_s3 + $0x88] sm:$0xff] }
   0x9   :  { %82 = vmatpush1.msra.mxu0 %v27_v12  ;;  %205 = vmatpush1.msra.mxu1 %v150_v15  ;;  %v140_v25 = vld [vmem:[%s802_s3 + $0x80] sm:$0xff]  ;;  %v139_v26 = vld [vmem:[%s802_s3 + $0x78] sm:$0xff]  ;;  %v138_v27 = vld [vmem:[%s802_s3 + $0x70] sm:$0xff] }
   0xa   :  { %395 = vmatmul.mubr.msk.f32.vlgmr.msra.gmra.mxu0 %vm47_vm0, %v26_v14  ;;  %206 = vmatprep.subr.mxu1 %v149_v16  ;;  %v137_v28 = vld [vmem:[%s802_s3 + $0x68] sm:$0xff]  ;;  %v136_v29 = vld [vmem:[%s802_s3 + $0x60] sm:$0xff]  ;;  %v135_v30 = vld [vmem:[%s802_s3 + $0x58] sm:$0xff] }
   0xb   :  { %207 = vmatpush1.msra.mxu1 %v148_v17  ;;  %v134_v31 = vld [vmem:[%s802_s3 + $0x50] sm:$0xff]  ;;  %v133_v32 = vld [vmem:[%s802_s3 + $0x48] sm:$0xff]  ;;  %v132_v33 = vld [vmem:[%s802_s3 + $0x40] sm:$0xff] }
   0xc   :  { %208 = vmatprep.subr.mxu1 %v147_v18  ;;  %v131_v34 = vld [vmem:[%s802_s3 + $0x38] sm:$0xff]  ;;  %v130_v35 = vld [vmem:[%s802_s3 + $0x30] sm:$0xff]  ;;  %v129_v36 = vld [vmem:[%s802_s3 + $0x28] sm:$0xff] }
   0xd   :  { %209 = vmatpush1.msra.mxu1 %v146_v19  ;;  %v128_v37 = vld [vmem:[%s802_s3 + $0x20] sm:$0xff]  ;;  %v127_v38 = vld [vmem:[%s802_s3 + $0x18] sm:$0xff]  ;;  %v126_v39 = vld [vmem:[%s802_s3 + $0x10] sm:$0xff] }
   0xe   :  { %210 = vmatprep.subr.mxu1 %v145_v20  ;;  %v125_v40 = vld [vmem:[%s802_s3 + $0x8] sm:$0xff]  ;;  %v124_v41 = vld [vmem:[%s802_s3] sm:$0xff]  ;;  %v187_v42 = vld [vmem:[%s802_s3 + $0x1f8] sm:$0xff] }
   0xf   :  { %211 = vmatpush1.msra.mxu1 %v144_v21  ;;  %v186_v43 = vld [vmem:[%s802_s3 + $0x1f0] sm:$0xff]  ;;  %v185_v44 = vld [vmem:[%s802_s3 + $0x1e8] sm:$0xff]  ;;  %v184_v45 = vld [vmem:[%s802_s3 + $0x1e0] sm:$0xff] }
  0x10   :  { %212 = vmatprep.subr.mxu1 %v143_v22  ;;  %v183_v46 = vld [vmem:[%s802_s3 + $0x1d8] sm:$0xff]  ;;  %v182_v47 = vld [vmem:[%s802_s3 + $0x1d0] sm:$0xff]  ;;  %v181_v48 = vld [vmem:[%s802_s3 + $0x1c8] sm:$0xff] }
  0x11   :  { %213 = vmatpush1.msra.mxu1 %v142_v23  ;;  %v180_v49 = vld [vmem:[%s802_s3 + $0x1c0] sm:$0xff]  ;;  %v179_v50 = vld [vmem:[%s802_s3 + $0x1b8] sm:$0xff]  ;;  %v178_v51 = vld [vmem:[%s802_s3 + $0x1b0] sm:$0xff] }
  0x12   :  { %214 = vmatprep.subr.mxu1 %v141_v24  ;;  %v177_v52 = vld [vmem:[%s802_s3 + $0x1a8] sm:$0xff]  ;;  %v176_v53 = vld [vmem:[%s802_s3 + $0x1a0] sm:$0xff]  ;;  %v175_v54 = vld [vmem:[%s802_s3 + $0x198] sm:$0xff] }
  0x13   :  { %215 = vmatpush1.msra.mxu1 %v140_v25  ;;  %v174_v55 = vld [vmem:[%s802_s3 + $0x190] sm:$0xff]  ;;  %v173_v56 = vld [vmem:[%s802_s3 + $0x188] sm:$0xff]  ;;  %v172_v57 = vld [vmem:[%s802_s3 + $0x180] sm:$0xff] }
  0x14   :  { %216 = vmatprep.subr.mxu1 %v139_v26  ;;  %v171_v58 = vld [vmem:[%s802_s3 + $0x178] sm:$0xff]  ;;  %v170_v59 = vld [vmem:[%s802_s3 + $0x170] sm:$0xff]  ;;  %v169_v60 = vld [vmem:[%s802_s3 + $0x168] sm:$0xff] }
  0x15   :  { %217 = vmatpush1.msra.mxu1 %v138_v27  ;;  %v168_v61 = vld [vmem:[%s802_s3 + $0x160] sm:$0xff]  ;;  %v167_v62 = vld [vmem:[%s802_s3 + $0x158] sm:$0xff]  ;;  %v166_v63 = vld [vmem:[%s802_s3 + $0x150] sm:$0xff] }
  0x16   :  { %218 = vmatprep.subr.mxu1 %v137_v28  ;;  %v165_v0 = vld [vmem:[%s802_s3 + $0x148] sm:$0xff]  ;;  %v164_v1 = vld [vmem:[%s802_s3 + $0x140] sm:$0xff]  ;;  %v163_v2 = vld [vmem:[%s802_s3 + $0x138] sm:$0xff] }
  0x17   :  { %219 = vmatpush1.msra.mxu1 %v136_v29  ;;  %v162_v3 = vld [vmem:[%s802_s3 + $0x130] sm:$0xff]  ;;  %v161_v4 = vld [vmem:[%s802_s3 + $0x128] sm:$0xff]  ;;  %v160_v5 = vld [vmem:[%s802_s3 + $0x120] sm:$0xff] }
  0x18   :  { %220 = vmatprep.subr.mxu1 %v135_v30  ;;  %v159_v6 = vld [vmem:[%s802_s3 + $0x118] sm:$0xff]  ;;  %v158_v7 = vld [vmem:[%s802_s3 + $0x110] sm:$0xff]  ;;  %v157_v8 = vld [vmem:[%s802_s3 + $0x108] sm:$0xff] }
  0x19   :  { %221 = vmatpush1.msra.mxu1 %v134_v31  ;;  %v156_v9 = vld [vmem:[%s802_s3 + $0x100] sm:$0xff]  ;;  %v304_v10 = vld [vmem:[%s804_s5 + $0xf8] sm:$0xff]  ;;  %v303_v12 = vld [vmem:[%s804_s5 + $0xf0] sm:$0xff] }
  0x1a   :  { %222 = vmatprep.subr.mxu1 %v133_v32  ;;  %v288_v11 = vld [vmem:[%s804_s5 + $0x78] sm:$0xff]  ;;  %397 = vmatprep.subr.mxu0 %v304_v10  ;;  %v287_v13 = vld [vmem:[%s804_s5 + $0x70] sm:$0xff]  ;;  %v302_v14 = vld [vmem:[%s804_s5 + $0xe8] sm:$0xff] }
  0x1b   :  { %223 = vmatpush1.msra.mxu1 %v132_v33  ;;  %398 = vmatpush3.msra.mxu0 %v288_v11  ;;  %v286_v15 = vld [vmem:[%s804_s5 + $0x68] sm:$0xff]  ;;  %v301_v16 = vld [vmem:[%s804_s5 + $0xe0] sm:$0xff]  ;;  %v300_v18 = vld [vmem:[%s804_s5 + $0xd8] sm:$0xff] }
  0x1c   :  { %224 = vmatprep.subr.mxu1 %v131_v34  ;;  %399 = vmatprep.subr.mxu0 %v303_v12  ;;  %v285_v17 = vld [vmem:[%s804_s5 + $0x60] sm:$0xff]  ;;  %v284_v19 = vld [vmem:[%s804_s5 + $0x58] sm:$0xff]  ;;  %v299_v20 = vld [vmem:[%s804_s5 + $0xd0] sm:$0xff]  ;;  %v37_v34 = vlaneseq }
  0x1d   :  { %225 = vmatpush1.msra.mxu1 %v130_v35  ;;  %400 = vmatpush3.msra.mxu0 %v287_v13  ;;  %v283_v21 = vld [vmem:[%s804_s5 + $0x50] sm:$0xff]  ;;  %v298_v22 = vld [vmem:[%s804_s5 + $0xc8] sm:$0xff]  ;;  %v297_v24 = vld [vmem:[%s804_s5 + $0xc0] sm:$0xff] }
  0x1e   :  { %226 = vmatprep.subr.mxu1 %v129_v36  ;;  %401 = vmatprep.subr.mxu0 %v302_v14  ;;  %v282_v23 = vld [vmem:[%s804_s5 + $0x48] sm:$0xff]  ;;  %v281_v25 = vld [vmem:[%s804_s5 + $0x40] sm:$0xff]  ;;  %v296_v26 = vld [vmem:[%s804_s5 + $0xb8] sm:$0xff]  ;;  %v38_v35 = vshrl.u32 %v37_v34, 7 }
  0x1f   :  { %227 = vmatpush1.msra.mxu1 %v128_v37  ;;  %402 = vmatpush3.msra.mxu0 %v286_v15  ;;  %v280_v27 = vld [vmem:[%s804_s5 + $0x38] sm:$0xff]  ;;  %v295_v28 = vld [vmem:[%s804_s5 + $0xb0] sm:$0xff]  ;;  %v294_v30 = vld [vmem:[%s804_s5 + $0xa8] sm:$0xff] }
  0x20   :  { %228 = vmatprep.subr.mxu1 %v127_v38  ;;  %403 = vmatprep.subr.mxu0 %v301_v16  ;;  %v279_v29 = vld [vmem:[%s804_s5 + $0x30] sm:$0xff]  ;;  %v278_v31 = vld [vmem:[%s804_s5 + $0x28] sm:$0xff]  ;;  %v293_v32 = vld [vmem:[%s804_s5 + $0xa0] sm:$0xff]  ;;  %v39_v36 = vsub.s32 0, %v38_v35  ;;  %v43_v38 = vsub.s32 1, %v38_v35 }
  0x21   :  { %229 = vmatpush1.msra.mxu1 %v126_v39  ;;  %404 = vmatpush3.msra.mxu0 %v285_v17  ;;  %v277_v33 = vld [vmem:[%s804_s5 + $0x20] sm:$0xff] }
  0x22   :  { %230 = vmatprep.subr.mxu1 %v125_v40  ;;  %405 = vmatprep.subr.mxu0 %v300_v18  ;;  %v35_v37 = vld [vmem:[%s805_s2] sm:$0x3] }
  0x23   :  { %231 = vmatpush1.msra.mxu1 %v124_v41  ;;  %406 = vmatpush3.msra.mxu0 %v284_v19  ;;  %v40_v39 = vrot.slane %v35_v37, %v39_v36  ;;  %v44_v40 = vrot.slane %v35_v37, %v43_v38 }
  0x24   :  { %232 = vmatprep.subr.mxu1 %v187_v42  ;;  %407 = vmatprep.subr.mxu0 %v299_v20 }
  0x25   :  { %233 = vmatpush2.msra.mxu1 %v186_v43  ;;  %408 = vmatpush3.msra.mxu0 %v283_v21 }
  0x26   :  { %234 = vmatprep.subr.mxu1 %v185_v44  ;;  %409 = vmatprep.subr.mxu0 %v298_v22 }
  0x27   :  { %235 = vmatpush2.msra.mxu1 %v184_v45  ;;  %410 = vmatpush3.msra.mxu0 %v282_v23 }
  0x28   :  { %236 = vmatprep.subr.mxu1 %v183_v46  ;;  %411 = vmatprep.subr.mxu0 %v297_v24 }
  0x29   :  { %237 = vmatpush2.msra.mxu1 %v182_v47  ;;  %412 = vmatpush3.msra.mxu0 %v281_v25  ;;  %v292_v47 = vld [vmem:[%s804_s5 + $0x98] sm:$0xff] }
  0x2a   :  { %238 = vmatprep.subr.mxu1 %v181_v48  ;;  %413 = vmatprep.subr.mxu0 %v296_v26  ;;  %v276_v48 = vld [vmem:[%s804_s5 + $0x18] sm:$0xff] }
  0x2b   :  { %239 = vmatpush2.msra.mxu1 %v180_v49  ;;  %414 = vmatpush3.msra.mxu0 %v280_v27  ;;  %v291_v49 = vld [vmem:[%s804_s5 + $0x90] sm:$0xff] }
  0x2c   :  { %240 = vmatprep.subr.mxu1 %v179_v50  ;;  %415 = vmatprep.subr.mxu0 %v295_v28  ;;  %v275_v50 = vld [vmem:[%s804_s5 + $0x10] sm:$0xff] }
  0x2d   :  { %241 = vmatpush2.msra.mxu1 %v178_v51  ;;  %416 = vmatpush3.msra.mxu0 %v279_v29  ;;  %v290_v51 = vld [vmem:[%s804_s5 + $0x88] sm:$0xff] }
  0x2e   :  { %242 = vmatprep.subr.mxu1 %v177_v52  ;;  %417 = vmatprep.subr.mxu0 %v294_v30  ;;  %v274_v52 = vld [vmem:[%s804_s5 + $0x8] sm:$0xff] }
  0x2f   :  { %243 = vmatpush2.msra.mxu1 %v176_v53  ;;  %418 = vmatpush3.msra.mxu0 %v278_v31  ;;  %v289_v53 = vld [vmem:[%s804_s5 + $0x80] sm:$0xff] }
  0x30   :  { %244 = vmatprep.subr.mxu1 %v175_v54  ;;  %419 = vmatprep.subr.mxu0 %v293_v32  ;;  %v273_v54 = vld [vmem:[%s804_s5] sm:$0xff] }
  0x31   :  { %245 = vmatpush2.msra.mxu1 %v174_v55  ;;  %420 = vmatpush3.msra.mxu0 %v277_v33  ;;  %v188_v55 = vld [vmem:[%s806_s4] sm:$0x3] }
  0x32   :  { %246 = vmatprep.subr.mxu1 %v173_v56  ;;  %421 = vmatprep.subr.mxu0 %v292_v47  ;;  %v193_v56 = vrot.slane %v188_v55, %v39_v36 }
  0x33   :  { %247 = vmatpush2.msra.mxu1 %v172_v57  ;;  %422 = vmatpush3.msra.mxu0 %v276_v48  ;;  %v197_v57 = vrot.slane %v188_v55, %v43_v38 }
  0x34   :  { %248 = vmatprep.subr.mxu1 %v171_v58  ;;  %423 = vmatprep.subr.mxu0 %v291_v49 }
  0x35   :  { %249 = vmatpush2.msra.mxu1 %v170_v59  ;;  %424 = vmatpush3.msra.mxu0 %v275_v50 }
  0x36   :  { %250 = vmatprep.subr.mxu1 %v169_v60  ;;  %425 = vmatprep.subr.mxu0 %v290_v51 }
  0x37   :  { %251 = vmatpush2.msra.mxu1 %v168_v61  ;;  %426 = vmatpush3.msra.mxu0 %v274_v52 }
  0x38   :  { %252 = vmatprep.subr.mxu1 %v167_v62  ;;  %427 = vmatprep.subr.mxu0 %v289_v53 }
  0x39   :  { %253 = vmatpush2.msra.mxu1 %v166_v63  ;;  %428 = vmatpush3.msra.mxu0 %v273_v54 }
  0x3a   :  { %254 = vmatprep.subr.mxu1 %v165_v0 }
  0x3b   :  { %255 = vmatpush2.msra.mxu1 %v164_v1  ;;  %v383_v1 = vand.u32 127, %v37_v34 }
  0x3c   :  { %256 = vmatprep.subr.mxu1 %v163_v2  ;;  %v396_v2 = vld [vmem:[%s807_s6] ss:$0 sm:$0xff] }
  0x3d   :  { %257 = vmatpush2.msra.mxu1 %v162_v3  ;;  %vm384_vm1 = vcmp.ge.s32.totalorder %v383_v1, 8  ;;  %vm385_vm2 = vcmp.lt.s32.totalorder %v383_v1, 16 }
  0x3e   :  { %258 = vmatprep.subr.mxu1 %v161_v4  ;;  %vm386_vm3 = vmand %vm384_vm1, %vm385_vm2 }
  0x3f   :  { %259 = vmatpush2.msra.mxu1 %v160_v5 }
  0x40   :  { %260 = vmatprep.subr.mxu1 %v159_v6 }
  0x41   :  { %261 = vmatpush2.msra.mxu1 %v158_v7 }
  0x42   :  { %262 = vmatprep.subr.mxu1 %v157_v8 }
  0x43   :  { %263 = vmatpush2.msra.mxu1 %v156_v9 }
  0xca   :  { %v117_v41 = vpop.f32.mrf.mxu0 }
  0xcb   :  { %v118_v42 = vadd.f32 %v117_v41, %v40_v39 }
  0xcc   :  { %v119_v43 = vpop.f32.mrf.mxu0 }
  0xcd   :  { %v120_v44 = vadd.f32 %v119_v43, %v44_v40  ;;  %v122_v46 = vmax.f32 %v118_v42, 0.0 }
  0xcf   :  { %v123_v45 = vmax.f32 %v120_v44, 0.0 }
  0xd1   :  { %264 = vmatprep.mubr.f32.mxu1 %v123_v45 }
  0xd2   :  { %265 = vmatmul.mubr.f32.vlgmr.msra.gmra.mxu1 %v122_v46 }
 0x192   :  { %v266_v58 = vpop.f32.mrf.mxu1 }
 0x193   :  { %v267_v59 = vadd.f32 %v266_v58, %v193_v56 }
 0x194   :  { %v268_v60 = vpop.f32.mrf.mxu1 }
 0x195   :  { %v269_v61 = vadd.f32 %v268_v60, %v197_v57  ;;  %v271_v63 = vmax.f32 %v267_v59, 0.0 }
 0x197   :  { %v272_v62 = vmax.f32 %v269_v61, 0.0 }
 0x199   :  { %376 = vmatprep.mubr.f32.mxu0 %v272_v62 }
 0x19a   :  { %377 = vmatmul.mubr.f32.vlgmr.msra.gmra.mxu0 %v271_v63 }
 0x25a   :  { %v429_v0 = vpop.f32.mrf.mxu0 }
 0x25c   :  { %v430_v3 = vpop.f32.mrf.mxu0 }
 0x25d   :  { %v431_v4 = vadd.f32 %v430_v3, %v429_v0 }
 0x25f   :  { %v379_v5 = vadd.f32 %v431_v4, %v396_v2 }
 0x261   :  { %v387_v6 = vmax.f32 %v379_v5, -1.0 }
 0x263   :  { %v388_v7 = vmin.f32 %v387_v6, 2.0 }
 0x265   :  { %v389_v8 = vsel %vm386_vm3, %v388_v7, %v379_v5 }
 0x266   :  { %390 = vst [vmem:[%s808_s7] sm:$0xff] %v389_v8 }

</bundles_post_ra>
